<compile_context>
chip_gen: v5e
topology: v5e:2x2
jax: 0.10.0
libtpu: 0.0.40
codegen_flags: <defaults>
</compile_context>

<pallas_src>
import math

import jax
import jax.numpy as jnp
from jax.experimental import pallas as pl
from jax.experimental.pallas import tpu as pltpu

DROP_P = 0.1  # matches F.dropout(p=0.1) in training mode


def _sdp_kernel(x_ref, mask_ref, o_ref):
    """Processes a (TB, N, N) block of batch elements per grid step."""
    n = x_ref.shape[-1]
    scale = math.sqrt(n / 5000.0)          # == 1 / sqrt(5000 / n)

    # Single minor-dim transpose of x; both matmuls below consume xT, so the
    # final output transpose is folded into the second contraction for free.
    xT = jnp.swapaxes(x_ref[...], -1, -2)              # (TB, N, N) f32
    xT_b = xT.astype(jnp.bfloat16)                     # bf16 operands -> MXU

    # qk[b, i, j] = sum_k x[b, k, i] * x[b, k, j]  == (x^T @ x)[i, j]
    qk = jnp.einsum("bik,bjk->bij", xT_b, xT_b,
                    preferred_element_type=jnp.float32)
    s = qk * scale

    # Numerically stable softmax over the last axis (f32 elementwise math).
    m = jnp.max(s, axis=-1, keepdims=True)
    e = jnp.exp(s - m)
    l = jnp.sum(e, axis=-1, keepdims=True)
    # Fold the 1/(1-p) dropout rescale into the softmax normalization.
    inv = (1.0 / (1.0 - DROP_P)) / l
    dropped = (e * inv * mask_ref[...]).astype(jnp.bfloat16)

    # out^T[b, i, j] = sum_k x[b, k, i] * dropped[b, j, k] == (dropped @ x)^T
    out_t = jnp.einsum("bik,bjk->bij", xT_b, dropped,
                       preferred_element_type=jnp.float32)
    o_ref[...] = out_t.astype(o_ref.dtype)


def _choose_tb(b, n):
    """Largest divisor of B whose per-step working set stays well inside VMEM."""
    # ~10 N^2 f32-equivalents live per batch element (double-buffered I/O
    # blocks + in-kernel temporaries); stay under the default scoped limit.
    budget_bytes = 24 * 1024 * 1024
    per_elem = 10 * n * n * 4
    tb = max(1, min(b, budget_bytes // max(per_elem, 1)))
    while b % tb:
        tb -= 1
    return tb


@jax.jit
def model_forward(x, key):
    """x: (B, N, N) float32; key: JAX PRNG key for the dropout mask."""
    B, S, D = x.shape
    assert S == D, "reference module requires square last-two dims"
    N = S

    # Dropout keep-mask (torch's RNG stream cannot be reproduced anyway);
    # passed as {0, 1} float so the kernel only needs one multiply per element.
    keep = jax.random.bernoulli(key, 1.0 - DROP_P, (B, N, N)).astype(x.dtype)

    TB = _choose_tb(B, N)
    grid = (B // TB,)
    blk = pl.BlockSpec((TB, N, N), lambda i: (i, 0, 0))

    # TODO(synk): for large N (>~1.5k) add a second grid axis tiling qk rows
    # (columns of x) so temporaries are O(tq*N), and set vmem_limit_bytes.
    return pl.pallas_call(
        _sdp_kernel,
        out_shape=jax.ShapeDtypeStruct((B, N, N), x.dtype),
        grid=grid,
        in_specs=[blk, blk],
        out_specs=blk,
        compiler_params=pltpu.CompilerParams(
            dimension_semantics=("parallel",),
        ),
    )(x, keep)


if __name__ == "__main__":
    key = jax.random.PRNGKey(0)
    kx, kd = jax.random.split(key)
    # Small square input consistent with the module's forward (B=2, N=64).
    x1 = jax.random.normal(kx, (2, 64, 64), dtype=jnp.float32)

    out = jax.block_until_ready(model_forward(x1, kd))
    assert out.shape == (2, 64, 64)
    assert bool(jnp.isfinite(out).all())
    print("KERNEL_OK")
</pallas_src>

<mosaic_0001>
module attributes {stable_mosaic.version = 11 : i64} {
  func.func @_sdp_kernel(%arg0: i32, %arg1: memref<2x64x64xf32, #tpu.memory_space<vmem>>, %arg2: memref<2x64x64xf32, #tpu.memory_space<vmem>>, %arg3: memref<2x64x64xf32, #tpu.memory_space<vmem>>) attributes {dimension_semantics = [#tpu.dimension_semantics<parallel>], iteration_bounds = array<i64: 1>, scalar_prefetch = 0 : i64, scratch_operands = 0 : i64, tpu.core_type = #tpu.core_type<tc>, window_params = [{transform_indices = @transform_0, window_bounds = array<i64: 2, 64, 64>}, {transform_indices = @transform_1, window_bounds = array<i64: 2, 64, 64>}, {transform_indices = @transform_2, window_bounds = array<i64: 2, 64, 64>}]} {
    %c0 = arith.constant 0 : index
    %c0_0 = arith.constant 0 : index
    %c0_1 = arith.constant 0 : index
    %0 = vector.load %arg1[%c0, %c0_0, %c0_1] : memref<2x64x64xf32, #tpu.memory_space<vmem>>, vector<2x64x64xf32>
    %1 = tpu.transpose %0, [0, 2, 1] : vector<2x64x64xf32> -> vector<2x64x64xf32>
    %2 = arith.truncf %1 : vector<2x64x64xf32> to vector<2x64x64xbf16>
    "tpu.trace_start"() <{level = 10 : i32, message = "bik,bjk->bij"}> : () -> ()
    %cst = arith.constant dense<0.000000e+00> : vector<2x64x64xf32>
    %3 = tpu.matmul %2, %2, %cst {dimension_numbers = #tpu.dot_dimension_numbers<[2], [2], [1], [1], [0, 0, 0, 1, 1, 1], [0], [0]>} : vector<2x64x64xbf16>, vector<2x64x64xbf16>, vector<2x64x64xf32> -> vector<2x64x64xf32>
    "tpu.trace_stop"() : () -> ()
    %cst_2 = arith.constant 0.113137081 : f32
    %4 = vector.broadcast %cst_2 : f32 to vector<2x64x64xf32>
    %5 = arith.mulf %3, %4 : vector<2x64x64xf32>
    %cst_3 = arith.constant dense<0xFF800000> : vector<2x64xf32>
    %6 = vector.multi_reduction <maximumf>, %5, %cst_3 [2] : vector<2x64x64xf32> to vector<2x64xf32>
    %7 = vector.shape_cast %6 : vector<2x64xf32> to vector<2x64x1xf32>
    %8 = vector.broadcast %7 : vector<2x64x1xf32> to vector<2x64x64xf32>
    %9 = arith.subf %5, %8 : vector<2x64x64xf32>
    %10 = math.exp %9 : vector<2x64x64xf32>
    %cst_4 = arith.constant dense<0.000000e+00> : vector<2x64xf32>
    %11 = vector.multi_reduction <add>, %10, %cst_4 [2] : vector<2x64x64xf32> to vector<2x64xf32>
    %12 = vector.shape_cast %11 : vector<2x64xf32> to vector<2x64x1xf32>
    %cst_5 = arith.constant 1.11111116 : f32
    %13 = vector.broadcast %cst_5 : f32 to vector<2x64x1xf32>
    %14 = arith.divf %13, %12 : vector<2x64x1xf32>
    %15 = vector.broadcast %14 : vector<2x64x1xf32> to vector<2x64x64xf32>
    %16 = arith.mulf %10, %15 : vector<2x64x64xf32>
    %c0_6 = arith.constant 0 : index
    %c0_7 = arith.constant 0 : index
    %c0_8 = arith.constant 0 : index
    %17 = vector.load %arg2[%c0_6, %c0_7, %c0_8] : memref<2x64x64xf32, #tpu.memory_space<vmem>>, vector<2x64x64xf32>
    %18 = arith.mulf %16, %17 : vector<2x64x64xf32>
    %19 = arith.truncf %18 : vector<2x64x64xf32> to vector<2x64x64xbf16>
    "tpu.trace_start"() <{level = 10 : i32, message = "bik,bjk->bij"}> : () -> ()
    %cst_9 = arith.constant dense<0.000000e+00> : vector<2x64x64xf32>
    %20 = tpu.matmul %2, %19, %cst_9 {dimension_numbers = #tpu.dot_dimension_numbers<[2], [2], [1], [1], [0, 0, 0, 1, 1, 1], [0], [0]>} : vector<2x64x64xbf16>, vector<2x64x64xbf16>, vector<2x64x64xf32> -> vector<2x64x64xf32>
    "tpu.trace_stop"() : () -> ()
    %c0_10 = arith.constant 0 : index
    %c0_11 = arith.constant 0 : index
    %c0_12 = arith.constant 0 : index
    %21 = vector.load %arg3[%c0_10, %c0_11, %c0_12] : memref<2x64x64xf32, #tpu.memory_space<vmem>>, vector<2x64x64xf32>
    tpu.vector_store %arg3[%c0_10, %c0_11, %c0_12], %20 {strides = array<i32>} : memref<2x64x64xf32, #tpu.memory_space<vmem>>, vector<2x64x64xf32>,
    return
  }
  func.func @transform_0(%arg0: i32) -> (i32, i32, i32) {
    %c0_i32 = arith.constant 0 : i32
    %c0_i32_0 = arith.constant 0 : i32
    %c0_i32_1 = arith.constant 0 : i32
    return %arg0, %c0_i32, %c0_i32_0 : i32, i32, i32
  }
  func.func @transform_1(%arg0: i32) -> (i32, i32, i32) {
    %c0_i32 = arith.constant 0 : i32
    %c0_i32_0 = arith.constant 0 : i32
    %c0_i32_1 = arith.constant 0 : i32
    return %arg0, %c0_i32, %c0_i32_0 : i32, i32, i32
  }
  func.func @transform_2(%arg0: i32) -> (i32, i32, i32) {
    %c0_i32 = arith.constant 0 : i32
    %c0_i32_0 = arith.constant 0 : i32
    %c0_i32_1 = arith.constant 0 : i32
    return %arg0, %c0_i32, %c0_i32_0 : i32, i32, i32
  }
}

</mosaic_0001>

<bundles_post_ra>
// kernel: model_forward.1
= control target key start
LH: loop header
LB: loop body
LE: loop exit
PB: predicated region body
PF: predicated region fallthrough
CT: control target
= control target key end

     0   :  { %s1840_s0 = inlined_call_operand.vmem [shape: f32[2,64,64], index: 0, kind: input, shape index: {}]   ;;  %s1841_s1 = inlined_call_operand.vmem [shape: f32[2,64,64], index: 1, kind: input, shape index: {}]   ;;  %s1842_s2 = inlined_call_operand.hbm [shape: f32[2,64,64], index: 2, kind: output, shape index: {}]  }
   0x1   :  { %v13_v0 = vld [vmem:[%s1840_s0] sm:$0xff]  ;;  %v14_v3 = vld [vmem:[%s1840_s0 + $0x8] sm:$0xff] }
   0x2   :  { %v21_v1 = vld [vmem:[%s1840_s0 + $0x40] sm:$0xff]  ;;  %v22_v4 = vld [vmem:[%s1840_s0 + $0x48] sm:$0xff] }
   0x3   :  { %v872_v2 = vpack.i.bf16 %v21_v1, %v13_v0 }
   0x5   :  { %873 = vxpose.xlu0.b32.start [1/8] (short) (narrow) %v872_v2, 64 }
   0x6   :  { %7 = vsyncpa [#allocation3], 0  ;;  %v874_v5 = vpack.i.bf16 %v22_v4, %v14_v3  ;;  %v15_v6 = vld [vmem:[%s1840_s0 + $0x10] sm:$0xff]  ;;  %v16_v9 = vld [vmem:[%s1840_s0 + $0x18] sm:$0xff]  ;;  %vm129_vm0 = vcmask 523264   ;;  %s840_s18 = sshll.u32 %s1842_s2, 4  ;;  %s841_s18 = int_to_ptr.hbm [resolvable:$true] %s840_s18 }
   0x7   :  { %v23_v7 = vld [vmem:[%s1840_s0 + $0x50] sm:$0xff]  ;;  %v24_v10 = vld [vmem:[%s1840_s0 + $0x58] sm:$0xff]  ;;  %v17_v12 = vld [vmem:[%s1840_s0 + $0x20] sm:$0xff]  ;;  %s1019_s19 = smov 128   ;;  %s1020_s20 = smov 8  }
   0x8   :  { %v876_v8 = vpack.i.bf16 %v23_v7, %v15_v6  ;;  %v878_v11 = vpack.i.bf16 %v24_v10, %v16_v9  ;;  %v25_v13 = vld [vmem:[%s1840_s0 + $0x60] sm:$0xff]  ;;  %v18_v15 = vld [vmem:[%s1840_s0 + $0x28] sm:$0xff]  ;;  %v19_v18 = vld [vmem:[%s1840_s0 + $0x30] sm:$0xff] }
   0x9   :  { %v880_v14 = vpack.i.bf16 %v25_v13, %v17_v12  ;;  %v26_v16 = vld [vmem:[%s1840_s0 + $0x68] sm:$0xff]  ;;  %v27_v19 = vld [vmem:[%s1840_s0 + $0x70] sm:$0xff]  ;;  %v20_v21 = vld [vmem:[%s1840_s0 + $0x38] sm:$0xff] }
   0xa   :  { %v882_v17 = vpack.i.bf16 %v26_v16, %v18_v15  ;;  %v884_v20 = vpack.i.bf16 %v27_v19, %v19_v18  ;;  %v28_v22 = vld [vmem:[%s1840_s0 + $0x78] sm:$0xff] }
   0xb   :  { %v886_v23 = vpack.i.bf16 %v28_v22, %v20_v21 }
   0xd   :  { %875 = vxpose.xlu0.b32.cont [2/8] (short) (narrow) %v874_v5, 64 }
  0x15   :  { %877 = vxpose.xlu0.b32.cont [3/8] (short) (narrow) %v876_v8, 64 }
  0x1d   :  { %879 = vxpose.xlu0.b32.cont [4/8] (short) (narrow) %v878_v11, 64 }
  0x25   :  { %881 = vxpose.xlu0.b32.cont [5/8] (short) (narrow) %v880_v14, 64 }
  0x2d   :  { %883 = vxpose.xlu0.b32.cont [6/8] (short) (narrow) %v882_v17, 64 }
  0x35   :  { %885 = vxpose.xlu0.b32.cont [7/8] (short) (narrow) %v884_v20, 64 }
  0x3d   :  { %887 = vxpose.xlu0.b32.end [8/8] (short) (narrow) %v886_v23, 64 }
  0xa9   :  { %v888_v24 = vpop.trf.xlu0 }
  0xaa   :  { %v892_v25 = vunpack.i.h.bf16 %v888_v24  ;;  %v889_v26 = vunpack.i.l.bf16 %v888_v24 }
  0xac   :  { %v101_v27 = vpack.c.bf16 %v892_v25, %v892_v25  ;;  %v93_v28 = vpack.c.bf16 %v889_v26, %v889_v26 }
  0xae   :  { %v179_v34 = vunpack.c.l.b16 %v101_v27  ;;  %v117_v35 = vunpack.c.l.b16 %v93_v28 }
  0xb1   :  { %v893_v29 = vpop.trf.xlu0 }
  0xb2   :  { %v897_v30 = vunpack.i.h.bf16 %v893_v29  ;;  %v894_v31 = vunpack.i.l.bf16 %v893_v29 }
  0xb4   :  { %v102_v32 = vpack.c.bf16 %v897_v30, %v897_v30  ;;  %v94_v33 = vpack.c.bf16 %v894_v31, %v894_v31 }
  0xb6   :  { %v180_v36 = vunpack.c.l.b16 %v102_v32  ;;  %v118_v37 = vunpack.c.l.b16 %v94_v33 }
  0xb8   :  { %v1084_v38 = vpack.c.b16 %v118_v37, %v117_v35  ;;  %v1086_v39 = vpack.c.b16 %v180_v36, %v179_v34 }
  0xb9   :  { %v898_v40 = vpop.trf.xlu0 }
  0xba   :  { %v902_v10 = vunpack.i.h.bf16 %v898_v40  ;;  %v899_v11 = vunpack.i.l.bf16 %v898_v40  ;;  %v131_v30 = vsel %vm129_vm0, %v1084_v38, 0  ;;  %v192_v31 = vsel %vm129_vm0, %v1086_v39, 0 }
  0xbc   :  { %v103_v18 = vpack.c.bf16 %v902_v10, %v902_v10  ;;  %v95_v19 = vpack.c.bf16 %v899_v11, %v899_v11 }
  0xbe   :  { %v181_v24 = vunpack.c.l.b16 %v103_v18  ;;  %v119_v25 = vunpack.c.l.b16 %v95_v19 }
  0xc1   :  { %v903_v41 = vpop.trf.xlu0 }
  0xc2   :  { %v907_v4 = vunpack.i.h.bf16 %v903_v41  ;;  %v904_v5 = vunpack.i.l.bf16 %v903_v41 }
  0xc4   :  { %v104_v14 = vpack.c.bf16 %v907_v4, %v907_v4  ;;  %v96_v15 = vpack.c.bf16 %v904_v5, %v904_v5 }
  0xc6   :  { %v182_v20 = vunpack.c.l.b16 %v104_v14  ;;  %v120_v21 = vunpack.c.l.b16 %v96_v15 }
  0xc8   :  { %v1104_v26 = vpack.c.b16 %v120_v21, %v119_v25  ;;  %v1106_v27 = vpack.c.b16 %v182_v20, %v181_v24 }
  0xc9   :  { %v908_v42 = vpop.trf.xlu0 }
  0xca   :  { %v912_v54 = vunpack.i.h.bf16 %v908_v42  ;;  %v909_v55 = vunpack.i.l.bf16 %v908_v42  ;;  %1852 = vst [vmem:[#allocation9_spill] sm:$0xff] %v1106_v27  ;;  %v134_v28 = vsel %vm129_vm0, %v1104_v26, 0  ;;  %v195_v29 = vsel %vm129_vm0, %v1106_v27, 0 }
  0xcc   :  { %v105_v0 = vpack.c.bf16 %v912_v54, %v912_v54  ;;  %v97_v1 = vpack.c.bf16 %v909_v55, %v909_v55 }
  0xce   :  { %v183_v12 = vunpack.c.l.b16 %v105_v0  ;;  %v121_v13 = vunpack.c.l.b16 %v97_v1 }
  0xd1   :  { %v913_v43 = vpop.trf.xlu0 }
  0xd2   :  { %v917_v47 = vunpack.i.h.bf16 %v913_v43  ;;  %v914_v48 = vunpack.i.l.bf16 %v913_v43 }
  0xd4   :  { %v106_v58 = vpack.c.bf16 %v917_v47, %v917_v47  ;;  %v98_v59 = vpack.c.bf16 %v914_v48, %v914_v48 }
  0xd6   :  { %v184_v6 = vunpack.c.l.b16 %v106_v58  ;;  %v122_v7 = vunpack.c.l.b16 %v98_v59 }
  0xd8   :  { %v1096_v16 = vpack.c.b16 %v122_v7, %v121_v13  ;;  %v1098_v17 = vpack.c.b16 %v184_v6, %v183_v12 }
  0xd9   :  { %v918_v44 = vpop.trf.xlu0 }
  0xda   :  { %v922_v45 = vunpack.i.h.bf16 %v918_v44  ;;  %v919_v46 = vunpack.i.l.bf16 %v918_v44  ;;  %1850 = vst [vmem:[#allocation7_spill] sm:$0xff] %v1096_v16  ;;  %v137_v22 = vsel %vm129_vm0, %v1096_v16, 0  ;;  %v198_v23 = vsel %vm129_vm0, %v1098_v17, 0 }
  0xdb   :  { %1851 = vst [vmem:[#allocation8_spill] sm:$0xff] %v1098_v17 }
  0xdc   :  { %v107_v49 = vpack.c.bf16 %v922_v45, %v922_v45  ;;  %v99_v50 = vpack.c.bf16 %v919_v46, %v919_v46 }
  0xde   :  { %v123_v60 = vunpack.c.l.b16 %v99_v50  ;;  %v185_v62 = vunpack.c.l.b16 %v107_v49 }
  0xe1   :  { %v923_v51 = vpop.trf.xlu0 }
  0xe2   :  { %v927_v52 = vunpack.i.h.bf16 %v923_v51  ;;  %v924_v53 = vunpack.i.l.bf16 %v923_v51 }
  0xe4   :  { %v108_v56 = vpack.c.bf16 %v927_v52, %v927_v52  ;;  %v100_v57 = vpack.c.bf16 %v924_v53, %v924_v53 }
  0xe6   :  { %v124_v61 = vunpack.c.l.b16 %v100_v57  ;;  %v186_v63 = vunpack.c.l.b16 %v108_v56 }
  0xe8   :  { %v1088_v2 = vpack.c.b16 %v124_v61, %v123_v60  ;;  %v1090_v3 = vpack.c.b16 %v186_v63, %v185_v62 }
  0xea   :  { %1848 = vst [vmem:[#allocation5_spill] sm:$0xff] %v1088_v2  ;;  %v140_v8 = vsel %vm129_vm0, %v1088_v2, 0  ;;  %v201_v9 = vsel %vm129_vm0, %v1090_v3, 0 }
  0xeb   :  { %1849 = vst [vmem:[#allocation6_spill] sm:$0xff] %v1090_v3  ;;  %146 = vmatpush.bf16.xpose.msra.mxu0 %v140_v8  ;;  %207 = vmatpush.bf16.xpose.msra.mxu1 %v201_v9 }
  0xf3   :  { %147 = vmatpush.bf16.xpose.msra.mxu0 %v137_v22  ;;  %208 = vmatpush.bf16.xpose.msra.mxu1 %v198_v23 }
  0xfb   :  { %148 = vmatpush.bf16.xpose.msra.mxu0 %v134_v28  ;;  %209 = vmatpush.bf16.xpose.msra.mxu1 %v195_v29 }
 0x103   :  { %149 = vmatpush.bf16.xpose.msra.mxu0 %v131_v30  ;;  %210 = vmatpush.bf16.xpose.msra.mxu1 %v192_v31 }
 0x10a   :  { %852 = vmatmul.msk.bf16.vlgmr.msra.gmra.mxu0 %vm129_vm0, %v1084_v38  ;;  %856 = vmatmul.msk.bf16.vlgmr.msra.gmra.mxu1 %vm129_vm0, %v1086_v39 }
 0x11a   :  { %853 = vmatmul.msk.bf16.gmra.mxu0 %vm129_vm0, %v1104_v26  ;;  %857 = vmatmul.msk.bf16.gmra.mxu1 %vm129_vm0, %v1106_v27 }
 0x12a   :  { %854 = vmatmul.msk.bf16.gmra.mxu0 %vm129_vm0, %v1096_v16  ;;  %858 = vmatmul.msk.bf16.gmra.mxu1 %vm129_vm0, %v1098_v17 }
 0x13a   :  { %855 = vmatmul.msk.bf16.gmra.mxu0 %vm129_vm0, %v1088_v2  ;;  %859 = vmatmul.msk.bf16.gmra.mxu1 %vm129_vm0, %v1090_v3 }
 0x187   :  { %v151_v32 = vpop.f32.mrf.mxu0  ;;  %v212_v33 = vpop.f32.mrf.mxu1 }
 0x188   :  { %v1157_v8 = vmul.f32 0.11313708, %v151_v32  ;;  %v1165_v12 = vmul.f32 0.11313708, %v212_v33 }
 0x18a   :  { %v248_v11 = vsel %vm129_vm0, %v1157_v8, -inf  ;;  %v272_v15 = vsel %vm129_vm0, %v1165_v12, -inf }
 0x18f   :  { %v153_v34 = vpop.f32.mrf.mxu0  ;;  %v214_v35 = vpop.f32.mrf.mxu1 }
 0x190   :  { %v1173_v18 = vmul.f32 0.11313708, %v153_v34  ;;  %v1177_v20 = vmul.f32 0.11313708, %v214_v35 }
 0x192   :  { %v251_v19 = vsel %vm129_vm0, %v1173_v18, -inf  ;;  %v275_v21 = vsel %vm129_vm0, %v1177_v20, -inf }
 0x197   :  { %v156_v36 = vpop.f32.mrf.mxu0  ;;  %v217_v37 = vpop.f32.mrf.mxu1 }
 0x198   :  { %v1132_v40 = vmul.f32 0.11313708, %v156_v36  ;;  %v1136_v42 = vmul.f32 0.11313708, %v217_v37 }
 0x19a   :  { %v254_v41 = vsel %vm129_vm0, %v1132_v40, -inf  ;;  %v278_v46 = vsel %vm129_vm0, %v1136_v42, -inf }
 0x19b   :  { %255 = vmax.xlane.f32.xlu1 %v254_v41 }
 0x19f   :  { %v158_v43 = vpop.f32.mrf.mxu0  ;;  %v219_v44 = vpop.f32.mrf.mxu1 }
 0x1a0   :  { %v1138_v45 = vmul.f32 0.11313708, %v158_v43  ;;  %v1167_v13 = vmul.f32 0.11313708, %v219_v44 }
 0x1a2   :  { %v257_v47 = vsel %vm129_vm0, %v1138_v45, -inf  ;;  %v281_v14 = vsel %vm129_vm0, %v1167_v13, -inf }
 0x1a3   :  { %279 = vmax.xlane.f32.xlu1 %v278_v46  ;;  %258 = vmax.xlane.f32.xlu2 %v257_v47 }
 0x1a7   :  { %v161_v48 = vpop.f32.mrf.mxu0  ;;  %v222_v49 = vpop.f32.mrf.mxu1 }
 0x1a8   :  { %v236_v50 = vmul.f32 0.11313708, %v161_v48  ;;  %v244_v52 = vmul.f32 0.11313708, %v222_v49 }
 0x1aa   :  { %v260_v51 = vsel %vm129_vm0, %v236_v50, -inf  ;;  %v284_v56 = vsel %vm129_vm0, %v244_v52, -inf }
 0x1ab   :  { %261 = vmax.xlane.f32.xlu1 %v260_v51 }
 0x1af   :  { %v163_v53 = vpop.f32.mrf.mxu0  ;;  %v224_v54 = vpop.f32.mrf.mxu1 }
 0x1b0   :  { %v237_v55 = vmul.f32 0.11313708, %v163_v53  ;;  %v245_v58 = vmul.f32 0.11313708, %v224_v54 }
 0x1b2   :  { %v263_v57 = vsel %vm129_vm0, %v237_v55, -inf  ;;  %v287_v62 = vsel %vm129_vm0, %v245_v58, -inf }
 0x1b3   :  { %285 = vmax.xlane.f32.xlu1 %v284_v56  ;;  %264 = vmax.xlane.f32.xlu2 %v263_v57 }
 0x1b7   :  { %v166_v59 = vpop.f32.mrf.mxu0  ;;  %v227_v61 = vpop.f32.mrf.mxu1 }
 0x1b8   :  { %v238_v60 = vmul.f32 0.11313708, %v166_v59  ;;  %v1149_v0 = vmul.f32 0.11313708, %v227_v61 }
 0x1ba   :  { %v266_v63 = vsel %vm129_vm0, %v238_v60, -inf  ;;  %v290_v5 = vsel %vm129_vm0, %v1149_v0, -inf }
 0x1bb   :  { %288 = vmax.xlane.f32.xlu2 %v287_v62  ;;  %267 = vmax.xlane.f32.xlu1 %v266_v63 }
 0x1bf   :  { %v168_v1 = vpop.f32.mrf.mxu0  ;;  %v229_v7 = vpop.f32.mrf.mxu1 }
 0x1c0   :  { %v1151_v4 = vmul.f32 0.11313708, %v168_v1  ;;  %v1159_v9 = vmul.f32 0.11313708, %v229_v7 }
 0x1c2   :  { %v269_v6 = vsel %vm129_vm0, %v1151_v4, -inf  ;;  %v293_v10 = vsel %vm129_vm0, %v1159_v9, -inf }
 0x1c3   :  { %291 = vmax.xlane.f32.xlu2 %v290_v5  ;;  %270 = vmax.xlane.f32.xlu1 %v269_v6 }
 0x1cb   :  { %294 = vmax.xlane.f32.xlu2 %v293_v10  ;;  %249 = vmax.xlane.f32.xlu1 %v248_v11 }
 0x1d3   :  { %282 = vmax.xlane.f32.xlu2 %v281_v14  ;;  %273 = vmax.xlane.f32.xlu1 %v272_v15 }
 0x1db   :  { %252 = vmax.xlane.f32.xlu2 %v251_v19 }
 0x1e3   :  { %276 = vmax.xlane.f32.xlu2 %v275_v21 }
 0x20e   :  { %v256_v22 = vpop.xlane.xlu1 %255 }
 0x20f   :  { %v298_v35 = vsub.f32 %v1132_v40, %v256_v22 }
 0x211   :  { %v316_v43 = vmul.f32 1.442695, %v298_v35 }
 0x216   :  { %v280_v23 = vpop.xlane.xlu1 %279  ;;  %v259_v24 = vpop.xlane.xlu2 %258 }
 0x217   :  { %v299_v40 = vsub.f32 %v1138_v45, %v259_v24  ;;  %v306_v45 = vsub.f32 %v1136_v42, %v280_v23 }
 0x219   :  { %v332_v42 = vmul.f32 1.442695, %v306_v45 }
 0x21e   :  { %v262_v25 = vpop.xlane.xlu1 %261 }
 0x21f   :  { %v300_v28 = vsub.f32 %v236_v50, %v262_v25 }
 0x221   :  { %v320_v29 = vmul.f32 1.442695, %v300_v28 }
 0x223   :  { %928 = vpow2.f32 %v320_v29 }
 0x226   :  { %v286_v30 = vpop.xlane.xlu1 %285  ;;  %v265_v31 = vpop.xlane.xlu2 %264 }
 0x227   :  { %v308_v32 = vsub.f32 %v244_v52, %v286_v30  ;;  %v301_v33 = vsub.f32 %v237_v55, %v265_v31  ;;  %v318_v55 = vmul.f32 1.442695, %v299_v40 }
 0x229   :  { %v1181_v34 = vpop.eup %928  ;;  %v336_v36 = vmul.f32 1.442695, %v308_v32  ;;  %v322_v37 = vmul.f32 1.442695, %v301_v33 }
 0x22a   :  { %v356_v41 = vsel %vm129_vm0, %v1181_v34, 0.0 }
 0x22b   :  { %930 = vpow2.f32 %v336_v36  ;;  %357 = vadd.xlane.f32.xlu2 %v356_v41 }
 0x22c   :  { %932 = vpow2.f32 %v322_v37 }
 0x22d   :  { %934 = vpow2.f32 %v316_v43 }
 0x22e   :  { %v289_v44 = vpop.xlane.xlu2 %288  ;;  %v268_v46 = vpop.xlane.xlu1 %267 }
 0x22f   :  { %v309_v47 = vsub.f32 %v245_v58, %v289_v44  ;;  %v302_v48 = vsub.f32 %v238_v60, %v268_v46 }
 0x231   :  { %v1186_v49 = vpop.eup %930  ;;  %v338_v50 = vmul.f32 1.442695, %v309_v47  ;;  %v324_v51 = vmul.f32 1.442695, %v302_v48 }
 0x232   :  { %v1188_v52 = vpop.eup %932  ;;  %v380_v53 = vsel %vm129_vm0, %v1186_v49, 0.0 }
 0x233   :  { %936 = vpow2.f32 %v338_v50  ;;  %381 = vadd.xlane.f32.xlu2 %v380_v53  ;;  %v359_v54 = vsel %vm129_vm0, %v1188_v52, 0.0  ;;  %v1195_v58 = vpop.eup %934 }
 0x234   :  { %938 = vpow2.f32 %v324_v51  ;;  %360 = vadd.xlane.f32.xlu1 %v359_v54  ;;  %v350_v1 = vsel %vm129_vm0, %v1195_v58, 0.0 }
 0x235   :  { %940 = vpow2.f32 %v318_v55 }
 0x236   :  { %v292_v56 = vpop.xlane.xlu2 %291  ;;  %v271_v57 = vpop.xlane.xlu1 %270 }
 0x237   :  { %v310_v59 = vsub.f32 %v1149_v0, %v292_v56  ;;  %v303_v63 = vsub.f32 %v1151_v4, %v271_v57 }
 0x239   :  { %v1198_v60 = vpop.eup %936  ;;  %v340_v61 = vmul.f32 1.442695, %v310_v59  ;;  %v326_v6 = vmul.f32 1.442695, %v303_v63 }
 0x23a   :  { %v1201_v62 = vpop.eup %938  ;;  %v383_v5 = vsel %vm129_vm0, %v1198_v60, 0.0 }
 0x23b   :  { %942 = vpow2.f32 %v340_v61  ;;  %351 = vadd.xlane.f32.xlu2 %v350_v1  ;;  %v362_v0 = vsel %vm129_vm0, %v1201_v62, 0.0  ;;  %v1210_v11 = vpop.eup %940 }
 0x23c   :  { %363 = vadd.xlane.f32.xlu0 %v362_v0  ;;  %384 = vadd.xlane.f32.xlu1 %v383_v5  ;;  %944 = vpow2.f32 %v332_v42  ;;  %v353_v21 = vsel %vm129_vm0, %v1210_v11, 0.0 }
 0x23d   :  { %946 = vpow2.f32 %v326_v6 }
 0x23e   :  { %v295_v7 = vpop.xlane.xlu2 %294  ;;  %v250_v10 = vpop.xlane.xlu1 %249 }
 0x23f   :  { %v296_v14 = vsub.f32 %v1157_v8, %v250_v10  ;;  %v311_v15 = vsub.f32 %v1159_v9, %v295_v7 }
 0x241   :  { %v1212_v4 = vpop.eup %942  ;;  %v312_v22 = vmul.f32 1.442695, %v296_v14  ;;  %v342_v23 = vmul.f32 1.442695, %v311_v15 }
 0x242   :  { %v386_v19 = vsel %vm129_vm0, %v1212_v4, 0.0  ;;  %v1220_v28 = vpop.eup %944 }
 0x243   :  { %387 = vadd.xlane.f32.xlu2 %v386_v19  ;;  %v1222_v29 = vpop.eup %946  ;;  %948 = vpow2.f32 %v312_v22  ;;  %v374_v30 = vsel %vm129_vm0, %v1220_v28, 0.0 }
 0x244   :  { %354 = vadd.xlane.f32.xlu1 %v353_v21  ;;  %950 = vpow2.f32 %v342_v23  ;;  %v365_v31 = vsel %vm129_vm0, %v1222_v29, 0.0 }
 0x246   :  { %v283_v24 = vpop.xlane.xlu2 %282  ;;  %v274_v25 = vpop.xlane.xlu1 %273 }
 0x247   :  { %v304_v8 = vsub.f32 %v1165_v12, %v274_v25  ;;  %v307_v9 = vsub.f32 %v1167_v13, %v283_v24 }
 0x249   :  { %v328_v32 = vmul.f32 1.442695, %v304_v8  ;;  %v334_v33 = vmul.f32 1.442695, %v307_v9  ;;  %v1230_v36 = vpop.eup %948 }
 0x24a   :  { %v1232_v37 = vpop.eup %950  ;;  %v344_v13 = vsel %vm129_vm0, %v1230_v36, 0.0 }
 0x24b   :  { %375 = vadd.xlane.f32.xlu2 %v374_v30  ;;  %952 = vpow2.f32 %v328_v32  ;;  %v389_v41 = vsel %vm129_vm0, %v1232_v37, 0.0 }
 0x24c   :  { %366 = vadd.xlane.f32.xlu1 %v365_v31  ;;  %954 = vpow2.f32 %v334_v33 }
 0x24e   :  { %v253_v35 = vpop.xlane.xlu2 %252 }
 0x24f   :  { %v297_v12 = vsub.f32 %v1173_v18, %v253_v35 }
 0x251   :  { %v314_v43 = vmul.f32 1.442695, %v297_v12  ;;  %v1239_v44 = vpop.eup %952 }
 0x252   :  { %v1241_v47 = vpop.eup %954  ;;  %v368_v18 = vsel %vm129_vm0, %v1239_v44, 0.0 }
 0x253   :  { %345 = vadd.xlane.f32.xlu2 %v344_v13  ;;  %956 = vpow2.f32 %v314_v43  ;;  %v377_v50 = vsel %vm129_vm0, %v1241_v47, 0.0 }
 0x254   :  { %390 = vadd.xlane.f32.xlu1 %v389_v41 }
 0x256   :  { %v277_v46 = vpop.xlane.xlu2 %276 }
 0x257   :  { %v305_v48 = vsub.f32 %v1177_v20, %v277_v46 }
 0x259   :  { %v330_v51 = vmul.f32 1.442695, %v305_v48  ;;  %v1248_v40 = vpop.eup %956 }
 0x25a   :  { %v347_v53 = vsel %vm129_vm0, %v1248_v40, 0.0 }
 0x25b   :  { %369 = vadd.xlane.f32.xlu2 %v368_v18  ;;  %958 = vpow2.f32 %v330_v51 }
 0x25c   :  { %378 = vadd.xlane.f32.xlu1 %v377_v50 }
 0x261   :  { %v1252_v54 = vpop.eup %958 }
 0x262   :  { %v371_v20 = vsel %vm129_vm0, %v1252_v54, 0.0 }
 0x264   :  { %348 = vadd.xlane.f32.xlu1 %v347_v53 }
 0x26c   :  { %372 = vadd.xlane.f32.xlu1 %v371_v20 }
 0x29e   :  { %v358_v55 = vpop.xlane.xlu2 %357 }
 0x29f   :  { %960 = vrcp.f32 %v358_v55  ;;  %v461_v14 = vand.u32 2147483647, %v358_v55  ;;  %v463_v15 = vand.u32 2147483648, %v358_v55  ;;  %vm457_vm2 = vweird.f32 %v358_v55 }
 0x2a1   :  { %vm1280_vm4 = vcmp.eq.f32.partialorder %v461_v14, 8.507059e+37  ;;  %v464_v30 = vor.u32 1.1754944e-38, %v463_v15 }
 0x2a5   :  { %v961_v56 = vpop.eup %960 }
 0x2a6   :  { %v453_v57 = vmul.f32 %v961_v56, %v358_v55  ;;  %v1256_v59 = vpop.xlane.xlu2 %381  ;;  %vm458_vm1 = vweird.f32 %v961_v56 }
 0x2a7   :  { %962 = vrcp.f32 %v1256_v59  ;;  %v361_v45 = vpop.xlane.xlu1 %360  ;;  %v583_v21 = vand.u32 2147483648, %v1256_v59  ;;  %vm1276_vm3 = vmor %vm457_vm2, %vm458_vm1  ;;  %vm577_vm5 = vweird.f32 %v1256_v59  ;;  %v581_v35 = vand.u32 2147483647, %v1256_v59 }
 0x2a8   :  { %964 = vrcp.f32 %v361_v45  ;;  %v454_v61 = vsub.f32 1.0, %v453_v57  ;;  %v476_v24 = vand.u32 2147483647, %v361_v45  ;;  %v478_v25 = vand.u32 2147483648, %v361_v45 }
 0x2a9   :  { %v1291_v12 = vor.u32 1.1754944e-38, %v583_v21  ;;  %vm472_vm6 = vweird.f32 %v361_v45  ;;  %vm1335_vm14 = vcmp.eq.f32.partialorder %v581_v35, 8.507059e+37 }
 0x2aa   :  { %v455_v1 = vmul.f32 %v961_v56, %v454_v61  ;;  %vm1296_vm7 = vcmp.eq.f32.partialorder %v476_v24, 8.507059e+37  ;;  %v479_v46 = vor.u32 1.1754944e-38, %v478_v25 }
 0x2ac   :  { %v456_v19 = vadd.f32 %v961_v56, %v455_v1 }
 0x2ad   :  { %v1259_v63 = vpop.eup %962 }
 0x2ae   :  { %v1261_v5 = vpop.eup %964  ;;  %v573_v0 = vmul.f32 %v1259_v63, %v1256_v59  ;;  %v1265_v42 = vpop.xlane.xlu2 %351  ;;  %v460_v33 = vsel %vm1276_vm3, %v961_v56, %v456_v19  ;;  %vm578_vm8 = vweird.f32 %v1259_v63 }
 0x2af   :  { %v468_v6 = vmul.f32 %v1261_v5, %v361_v45  ;;  %966 = vrcp.f32 %v1265_v42  ;;  %v1269_v7 = vpop.xlane.xlu0 %363  ;;  %v1271_v10 = vpop.xlane.xlu1 %384  ;;  %vm473_vm9 = vweird.f32 %v1261_v5  ;;  %v433_v50 = vand.u32 2147483648, %v1265_v42  ;;  %vm1349_vm15 = vmor %vm577_vm5, %vm578_vm8 }
 0x2b0   :  { %968 = vrcp.f32 %v1269_v7  ;;  %v574_v23 = vsub.f32 1.0, %v573_v0  ;;  %v465_v57 = vsel %vm1280_vm4, %v464_v30, %v460_v33  ;;  %v491_v1 = vand.u32 2147483647, %v1269_v7  ;;  %vm1328_vm11 = vmor %vm472_vm6, %vm473_vm9 }
 0x2b1   :  { %v469_v22 = vsub.f32 1.0, %v468_v6  ;;  %970 = vrcp.f32 %v1271_v10  ;;  %v493_v0 = vand.u32 2147483648, %v1269_v7  ;;  %vm427_vm10 = vweird.f32 %v1265_v42 }
 0x2b2   :  { %v575_v41 = vmul.f32 %v1259_v63, %v574_v23  ;;  %v431_v15 = vand.u32 2147483647, %v1265_v42  ;;  %vm487_vm12 = vweird.f32 %v1269_v7  ;;  %v1343_v25 = vor.u32 1.1754944e-38, %v433_v50 }
 0x2b3   :  { %v470_v31 = vmul.f32 %v1261_v5, %v469_v22  ;;  %v466_v22 = vmul.f32 1.1111112, %v465_v57  ;;  %vm1354_vm1 = vcmp.eq.f32.partialorder %v491_v1, 8.507059e+37  ;;  %v598_v33 = vand.u32 2147483648, %v1271_v10 }
 0x2b4   :  { %v576_v14 = vadd.f32 %v1259_v63, %v575_v41  ;;  %vm592_vm4 = vweird.f32 %v1271_v10 }
 0x2b5   :  { %v1286_v32 = vpop.eup %966  ;;  %v471_v55 = vadd.f32 %v1261_v5, %v470_v31  ;;  %v636_v57 = vmul.f32 %v1181_v34, %v466_v22  ;;  %v1400_v43 = vor.u32 1.1754944e-38, %v598_v33 }
 0x2b6   :  { %v1293_v13 = vpop.eup %968  ;;  %v423_v48 = vmul.f32 %v1286_v32, %v1265_v42  ;;  %v1302_v18 = vpop.xlane.xlu2 %387  ;;  %v580_v41 = vsel %vm1349_vm15, %v1259_v63, %v576_v14  ;;  %vm428_vm2 = vweird.f32 %v1286_v32 }
 0x2b7   :  { %v483_v51 = vmul.f32 %v1293_v13, %v1269_v7  ;;  %v1309_v53 = vpop.xlane.xlu1 %354  ;;  %v1311_v20 = vpop.eup %970  ;;  %972 = vrcp.f32 %v1302_v18  ;;  %vm488_vm13 = vweird.f32 %v1293_v13  ;;  %v475_v24 = vsel %vm1328_vm11, %v1261_v5, %v471_v55  ;;  %vm1412_vm6 = vmor %vm427_vm10, %vm428_vm2 }
 0x2b8   :  { %v424_v56 = vsub.f32 1.0, %v423_v48  ;;  %v588_v6 = vmul.f32 %v1311_v20, %v1271_v10  ;;  %974 = vrcp.f32 %v1309_v53  ;;  %v494_v5 = vor.u32 1.1754944e-38, %v493_v0  ;;  %vm1369_vm3 = vmor %vm487_vm12, %vm488_vm13 }
 0x2b9   :  { %v484_v61 = vsub.f32 1.0, %v483_v51  ;;  %v613_v50 = vand.u32 2147483648, %v1302_v18  ;;  %vm593_vm5 = vweird.f32 %v1311_v20  ;;  %v611_v34 = vand.u32 2147483647, %v1302_v18 }
 0x2ba   :  { %v425_v45 = vmul.f32 %v1286_v32, %v424_v56  ;;  %v589_v8 = vsub.f32 1.0, %v588_v6  ;;  %v480_v56 = vsel %vm1296_vm7, %v479_v46, %v475_v24  ;;  %v448_v6 = vand.u32 2147483648, %v1309_v53  ;;  %vm1453_vm11 = vmor %vm592_vm4, %vm593_vm5 }
 0x2bb   :  { %v485_v21 = vmul.f32 %v1293_v13, %v484_v61  ;;  %vm1416_vm7 = vcmp.eq.f32.partialorder %v431_v15, 8.507059e+37  ;;  %vm442_vm8 = vweird.f32 %v1309_v53  ;;  %v446_v31 = vand.u32 2147483647, %v1309_v53 }
 0x2bc   :  { %v1391_v1 = vadd.f32 %v1286_v32, %v425_v45  ;;  %v590_v0 = vmul.f32 %v1311_v20, %v589_v8  ;;  %v1420_v45 = vor.u32 1.1754944e-38, %v613_v50  ;;  %v1431_v15 = vor.u32 1.1754944e-38, %v448_v6 }
 0x2bd   :  { %v486_v30 = vadd.f32 %v1293_v13, %v485_v21  ;;  %v1359_v35 = vpop.eup %972  ;;  %v481_v21 = vmul.f32 1.1111112, %v480_v56  ;;  %vm607_vm9 = vweird.f32 %v1302_v18  ;;  %v1439_v59 = vsel %vm1335_vm14, %v1291_v12, %v580_v41 }
 0x2be   :  { %v1376_v51 = vpop.xlane.xlu2 %375  ;;  %v603_v55 = vmul.f32 %v1359_v35, %v1302_v18  ;;  %v1388_v61 = vpop.eup %974  ;;  %v1428_v42 = vadd.f32 %v1311_v20, %v590_v0  ;;  %vm608_vm10 = vweird.f32 %v1359_v35  ;;  %vm1483_vm14 = vcmp.eq.f32.partialorder %v611_v34, 8.507059e+37 }
 0x2bf   :  { %v490_v63 = vsel %vm1369_vm3, %v1293_v13, %v486_v30  ;;  %v1383_v7 = vpop.xlane.xlu1 %366  ;;  %976 = vrcp.f32 %v1376_v51  ;;  %v652_v13 = vld [vmem:[%s1841_s1 + $0x20] sm:$0xff]  ;;  %v438_v46 = vmul.f32 %v1388_v61, %v1309_v53  ;;  %v430_v30 = vsel %vm1412_vm6, %v1286_v32, %v1391_v1  ;;  %vm1528_vm4 = vmor %vm607_vm9, %vm608_vm10 }
 0x2c0   :  { %v495_v14 = vsel %vm1354_vm1, %v494_v5, %v490_v63  ;;  %v604_v19 = vsub.f32 1.0, %v603_v55  ;;  %978 = vrcp.f32 %v1383_v7  ;;  %v668_v9 = vmul.f32 %v652_v13, %v636_v57 }
 0x2c1   :  { %v439_v8 = vsub.f32 1.0, %v438_v46  ;;  %v496_v33 = vmul.f32 1.1111112, %v495_v14  ;;  %v553_v63 = vand.u32 2147483648, %v1376_v51  ;;  %v506_v55 = vand.u32 2147483647, %v1383_v7 }
 0x2c2   :  { %v605_v50 = vmul.f32 %v1359_v35, %v604_v19  ;;  %v637_v57 = vmul.f32 %v1188_v52, %v481_v21  ;;  %v508_v41 = vand.u32 2147483648, %v1383_v7  ;;  %v653_v52 = vld [vmem:[%s1841_s1 + $0x28] sm:$0xff]  ;;  %v684_v0 = vpack.c.bf16 %v668_v9, %v668_v9 }
 0x2c3   :  { %v440_v5 = vmul.f32 %v1388_v61, %v439_v8  ;;  %vm443_vm12 = vweird.f32 %v1388_v61  ;;  %vm502_vm13 = vweird.f32 %v1383_v7  ;;  %v638_v22 = vmul.f32 %v1201_v62, %v496_v33 }
 0x2c4   :  { %v606_v8 = vadd.f32 %v1359_v35, %v605_v50  ;;  %vm547_vm15 = vweird.f32 %v1376_v51  ;;  %v1488_v13 = vor.u32 1.1754944e-38, %v553_v63  ;;  %v669_v46 = vmul.f32 %v653_v52, %v637_v57  ;;  %vm1504_vm2 = vmor %vm442_vm8, %vm443_vm12 }
 0x2c5   :  { %v1441_v32 = vpop.eup %976  ;;  %v1476_v14 = vadd.f32 %v1388_v61, %v440_v5  ;;  %vm1494_vm1 = vcmp.eq.f32.partialorder %v506_v55, 8.507059e+37  ;;  %v509_v34 = vor.u32 1.1754944e-38, %v508_v41  ;;  %v1498_v33 = vunpack.c.l.b16 %v684_v0 }
 0x2c6   :  { %v1446_v56 = vpop.xlane.xlu2 %345  ;;  %v543_v12 = vmul.f32 %v1441_v32, %v1376_v51  ;;  %v1466_v6 = vpop.eup %978  ;;  %vm548_vm3 = vweird.f32 %v1441_v32  ;;  %v435_v57 = vsel %vm1416_vm7, %v1343_v25, %v430_v30  ;;  %vm1532_vm5 = vcmp.eq.f32.partialorder %v446_v31, 8.507059e+37 }
 0x2c7   :  { %980 = vrcp.f32 %v1446_v56  ;;  %v1461_v1 = vpop.xlane.xlu1 %390  ;;  %v498_v21 = vmul.f32 %v1466_v6, %v1383_v7  ;;  %v403_v5 = vand.u32 2147483648, %v1446_v56  ;;  %v445_v53 = vsel %vm1504_vm2, %v1388_v61, %v1476_v14  ;;  %vm1570_vm12 = vmor %vm547_vm15, %vm548_vm3 }
 0x2c8   :  { %982 = vrcp.f32 %v1461_v1  ;;  %v544_v19 = vsub.f32 1.0, %v543_v12  ;;  %v654_v12 = vld [vmem:[%s1841_s1 + $0x30] sm:$0xff]  ;;  %v628_v0 = vand.u32 2147483648, %v1461_v1  ;;  %vm503_vm6 = vweird.f32 %v1466_v6 }
 0x2c9   :  { %v499_v48 = vsub.f32 1.0, %v498_v21  ;;  %vm397_vm7 = vweird.f32 %v1446_v56  ;;  %v1540_v61 = vor.u32 1.1754944e-38, %v403_v5  ;;  %v685_v18 = vpack.c.bf16 %v669_v46, %v669_v46  ;;  %vm504_vm9 = vmor %vm502_vm13, %vm503_vm6 }
 0x2ca   :  { %v545_v63 = vmul.f32 %v1441_v32, %v544_v19  ;;  %v670_v19 = vmul.f32 %v654_v12, %v638_v22  ;;  %v626_v22 = vand.u32 2147483647, %v1461_v1  ;;  %v610_v50 = vsel %vm1528_vm4, %v1359_v35, %v606_v8 }
 0x2cb   :  { %v500_v52 = vmul.f32 %v1466_v6, %v499_v48  ;;  %vm622_vm8 = vweird.f32 %v1461_v1  ;;  %v436_v46 = vmul.f32 1.1111112, %v435_v57  ;;  %v629_v3 = vor.u32 1.1754944e-38, %v628_v0 }
 0x2cc   :  { %v1554_v55 = vadd.f32 %v1441_v32, %v545_v63  ;;  %v686_v2 = vpack.c.bf16 %v670_v19, %v670_v19  ;;  %v709_v63 = vunpack.c.l.b16 %v685_v18  ;;  %vm1575_vm2 = vcmp.eq.f32.partialorder %v626_v22, 8.507059e+37 }
 0x2cd   :  { %v1514_v41 = vpop.eup %980  ;;  %v501_v14 = vadd.f32 %v1466_v6, %v500_v52  ;;  %v1889_v62 = vand.u32 2147483647, %v1271_v10  ;;  %v586_v24 = vmul.f32 1.1111112, %v1439_v59  ;;  %v1898_v59 = vand.u32 2147483647, %v1446_v56 }
 0x2ce   :  { %v1522_v21 = vpop.eup %982  ;;  %v393_v48 = vmul.f32 %v1514_v41, %v1446_v56  ;;  %v1542_v30 = vpop.xlane.xlu2 %369  ;;  %vm398_vm10 = vweird.f32 %v1514_v41  ;;  %v1901_v7 = vand.u32 2147483647, %v1376_v51 }
 0x2cf   :  { %v618_v31 = vmul.f32 %v1522_v21, %v1461_v1  ;;  %v1548_v12 = vpop.xlane.xlu1 %378  ;;  %984 = vrcp.f32 %v1542_v30  ;;  %v523_v8 = vand.u32 2147483648, %v1542_v30  ;;  %v521_v19 = vand.u32 2147483647, %v1542_v30 }
 0x2d0   :  { %v394_v5 = vsub.f32 1.0, %v393_v48  ;;  %986 = vrcp.f32 %v1548_v12  ;;  %v505_v25 = vsel %vm504_vm9, %v1466_v6, %v501_v14  ;;  %v615_v48 = vsel %vm1483_vm14, %v1420_v45, %v610_v50 }
 0x2d1   :  { %v619_v52 = vsub.f32 1.0, %v618_v31  ;;  %v568_v22 = vand.u32 2147483648, %v1548_v12  ;;  %vm623_vm13 = vweird.f32 %v1522_v21  ;;  %vm517_vm15 = vweird.f32 %v1542_v30 }
 0x2d2   :  { %v395_v35 = vmul.f32 %v1514_v41, %v394_v5  ;;  %v510_v5 = vsel %vm1494_vm1, %v509_v34, %v505_v25  ;;  %v524_v50 = vor.u32 1.1754944e-38, %v523_v8  ;;  %v616_v18 = vmul.f32 1.1111112, %v615_v48  ;;  %vm1613_vm1 = vmor %vm397_vm7, %vm398_vm10 }
 0x2d3   :  { %v620_v0 = vmul.f32 %v1522_v21, %v619_v52  ;;  %v511_v45 = vmul.f32 1.1111112, %v510_v5  ;;  %v655_v52 = vld [vmem:[%s1841_s1 + $0x38] sm:$0xff]  ;;  %vm1605_vm14 = vcmp.eq.f32.partialorder %v1889_v62, 8.507059e+37  ;;  %vm1618_vm3 = vcmp.eq.f32.partialorder %v521_v19, 8.507059e+37  ;;  %vm1643_vm6 = vmor %vm622_vm8, %vm623_vm13 }
 0x2d4   :  { %v1589_v31 = vadd.f32 %v1514_v41, %v395_v35  ;;  %v710_v35 = vunpack.c.l.b16 %v686_v2  ;;  %v714_v48 = vpack.c.b16 %v709_v63, %v1498_v33  ;;  %v450_v5 = vsel %vm1532_vm5, %v1431_v15, %v445_v53 }
 0x2d5   :  { %v985_v9 = vpop.eup %984  ;;  %v621_v14 = vadd.f32 %v1522_v21, %v620_v0  ;;  %v639_v10 = vmul.f32 %v1222_v29, %v511_v45  ;;  %vm562_vm4 = vweird.f32 %v1548_v12  ;;  %v1636_v6 = vor.u32 1.1754944e-38, %v568_v22 }
 0x2d6   :  { %v1601_v17 = vpop.eup %986  ;;  %v513_v0 = vmul.f32 %v985_v9, %v1542_v30  ;;  %v634_v53 = vmul.f32 %v1195_v58, %v436_v46  ;;  %v646_v45 = vmul.f32 %v1212_v4, %v616_v18  ;;  %v451_v62 = vmul.f32 1.1111112, %v450_v5  ;;  %v662_v58 = vld [vmem:[%s1841_s1 + $0x70] sm:$0xff] }
 0x2d7   :  { %v1622_v25 = vpop.xlane.xlu1 %348  ;;  %v558_v19 = vmul.f32 %v1601_v17, %v1548_v12  ;;  %v671_v33 = vmul.f32 %v655_v52, %v639_v10  ;;  %v625_v22 = vsel %vm1643_vm6, %v1522_v21, %v621_v14  ;;  %vm518_vm5 = vweird.f32 %v985_v9  ;;  %v650_v14 = vld [vmem:[%s1841_s1 + $0x10] sm:$0xff] }
 0x2d8   :  { %988 = vrcp.f32 %v1622_v25  ;;  %v514_v15 = vsub.f32 1.0, %v513_v0  ;;  %v1654_v27 = vsel %vm129_vm0, %v714_v48, 0  ;;  %vm1661_vm7 = vcmp.eq.f32.partialorder %v1898_v59, 8.507059e+37  ;;  %v651_v48 = vld [vmem:[%s1841_s1 + $0x18] sm:$0xff]  ;;  %vm519_vm10 = vmor %vm517_vm15, %vm518_vm5 }
 0x2d9   :  { %v559_v63 = vsub.f32 1.0, %v558_v19  ;;  %v687_v1 = vpack.c.bf16 %v671_v33, %v671_v33  ;;  %vm563_vm8 = vweird.f32 %v1601_v17  ;;  %v630_v4 = vsel %vm1575_vm2, %v629_v3, %v625_v22  ;;  %v649_v3 = vld [vmem:[%s1841_s1 + $0x8] sm:$0xff] }
 0x2da   :  { %v515_v16 = vmul.f32 %v985_v9, %v514_v15  ;;  %v635_v18 = vmul.f32 %v1210_v11, %v451_v62  ;;  %v416_v56 = vand.u32 2147483647, %v1622_v25  ;;  %v418_v0 = vand.u32 2147483648, %v1622_v25  ;;  %vm1709_vm13 = vmor %vm562_vm4, %vm563_vm8 }
 0x2db   :  { %v560_v21 = vmul.f32 %v1601_v17, %v559_v63  ;;  %v711_v10 = vunpack.c.l.b16 %v687_v1  ;;  %vm1680_vm9 = vcmp.eq.f32.partialorder %v1901_v7, 8.507059e+37  ;;  %vm412_vm2 = vweird.f32 %v1622_v25 }
 0x2dc   :  { %v516_v52 = vadd.f32 %v985_v9, %v515_v16  ;;  %v631_v11 = vmul.f32 1.1111112, %v630_v4  ;;  %v678_v62 = vmul.f32 %v662_v58, %v646_v45  ;;  %v666_v33 = vmul.f32 %v650_v14, %v634_v53  ;;  %v659_v53 = vld [vmem:[%s1841_s1 + $0x58] sm:$0xff] }
 0x2dd   :  { %v1688_v16 = vadd.f32 %v1601_v17, %v560_v21  ;;  %v715_v15 = vpack.c.b16 %v711_v10, %v710_v35  ;;  %v667_v30 = vmul.f32 %v651_v48, %v635_v18  ;;  %v1904_v22 = vsel %vm1453_vm11, %v1311_v20, %v1428_v42  ;;  %v661_v10 = vld [vmem:[%s1841_s1 + $0x68] sm:$0xff] }
 0x2de   :  { %v989_v5 = vpop.eup %988  ;;  %v520_v19 = vsel %vm519_vm10, %v985_v9, %v516_v52  ;;  %v600_v9 = vsel %vm1605_vm14, %v1400_v43, %v1904_v22  ;;  %vm1713_vm15 = vcmp.eq.f32.partialorder %v416_v56, 8.507059e+37  ;;  %v419_v23 = vor.u32 1.1754944e-38, %v418_v0  ;;  %v663_v43 = vld [vmem:[%s1841_s1 + $0x78] sm:$0xff] }
 0x2df   :  { %v408_v29 = vmul.f32 %v989_v5, %v1622_v25  ;;  %v1692_v51 = vpop.xlane.xlu1 %372  ;;  %v525_v63 = vsel %vm1618_vm3, %v524_v50, %v520_v19  ;;  %v726_v20 = vsel %vm129_vm0, %v715_v15, 0  ;;  %v565_v42 = vsel %vm1709_vm13, %v1601_v17, %v1688_v16  ;;  %v660_v17 = vld [vmem:[%s1841_s1 + $0x60] sm:$0xff] }
 0x2e0   :  { %990 = vrcp.f32 %v1692_v51  ;;  %v1909_v34 = vand.u32 2147483647, %v1548_v12  ;;  %vm413_vm14 = vweird.f32 %v989_v5  ;;  %732 = vmatpush.bf16.xpose.msra.mxu2 %v726_v20  ;;  %v647_v45 = vmul.f32 %v1232_v37, %v631_v11 }
 0x2e1   :  { %v409_v50 = vsub.f32 1.0, %v408_v29  ;;  %v694_v1 = vpack.c.bf16 %v678_v62, %v678_v62  ;;  %v1732_v58 = vmul.f32 1.1111112, %v525_v63  ;;  %v682_v21 = vpack.c.bf16 %v666_v33, %v666_v33  ;;  %vm414_vm4 = vmor %vm412_vm2, %vm413_vm14 }
 0x2e2   :  { %vm1727_vm11 = vcmp.eq.f32.partialorder %v1909_v34, 8.507059e+37  ;;  %v601_v4 = vmul.f32 1.1111112, %v600_v9  ;;  %v536_v12 = vand.u32 2147483647, %v1692_v51  ;;  %v679_v18 = vmul.f32 %v663_v43, %v647_v45 }
 0x2e3   :  { %v410_v59 = vmul.f32 %v989_v5, %v409_v50  ;;  %v683_v14 = vpack.c.bf16 %v667_v30, %v667_v30  ;;  %v644_v52 = vmul.f32 %v1186_v49, %v586_v24  ;;  %vm532_vm3 = vweird.f32 %v1692_v51 }
 0x2e4   :  { %v538_v37 = vand.u32 2147483648, %v1692_v51  ;;  %v645_v0 = vmul.f32 %v1198_v60, %v601_v4  ;;  %v1912_v48 = vsel %vm1613_vm1, %v1514_v41, %v1589_v31  ;;  %v695_v7 = vpack.c.bf16 %v679_v18, %v679_v18 }
 0x2e5   :  { %v411_v56 = vadd.f32 %v989_v5, %v410_v59  ;;  %v405_v49 = vsel %vm1661_vm7, %v1540_v61, %v1912_v48  ;;  %v771_v60 = vunpack.c.l.b16 %v694_v1  ;;  %v676_v16 = vmul.f32 %v660_v17, %v644_v52 }
 0x2e6   :  { %v991_v24 = vpop.eup %990  ;;  %v406_v11 = vmul.f32 1.1111112, %v405_v49  ;;  %v706_v8 = vunpack.c.l.b16 %v682_v21  ;;  %v1913_v41 = vsel %vm1570_vm12, %v1441_v32, %v1554_v55  ;;  %v772_v31 = vunpack.c.l.b16 %v695_v7 }
 0x2e7   :  { %v415_v62 = vsel %vm414_vm4, %v989_v5, %v411_v56  ;;  %v528_v19 = vmul.f32 %v991_v24, %v1692_v51  ;;  %v555_v61 = vsel %vm1680_vm9, %v1488_v13, %v1913_v41  ;;  %v707_v25 = vunpack.c.l.b16 %v683_v14  ;;  %v648_v5 = vld [vmem:[%s1841_s1] sm:$0xff] }
 0x2e8   :  { %v677_v46 = vmul.f32 %v661_v10, %v645_v0  ;;  %v420_v29 = vsel %vm1713_vm15, %v419_v23, %v415_v62  ;;  %vm533_vm1 = vweird.f32 %v991_v24  ;;  %v632_v33 = vmul.f32 %v1230_v36, %v406_v11  ;;  %733 = vmatpush.bf16.xpose.msra.mxu2 %v1654_v27  ;;  %v658_v27 = vld [vmem:[%s1841_s1 + $0x50] sm:$0xff] }
 0x2e9   :  { %v529_v15 = vsub.f32 1.0, %v528_v19  ;;  %v421_v57 = vmul.f32 1.1111112, %v420_v29  ;;  %v776_v32 = vpack.c.b16 %v772_v31, %v771_v60  ;;  %v692_v55 = vpack.c.bf16 %v676_v16, %v676_v16  ;;  %vm534_vm12 = vmor %vm532_vm3, %vm533_vm1  ;;  %v1914_v31 = vld [vmem:[#allocation9_spill] sm:$0xff] }
 0x2ea   :  { %v693_v13 = vpack.c.bf16 %v677_v46, %v677_v46  ;;  %v556_v63 = vmul.f32 1.1111112, %v555_v61  ;;  %v664_v9 = vmul.f32 %v648_v5, %v632_v33  ;;  %v570_v35 = vsel %vm1727_vm11, %v1636_v6, %v565_v42  ;;  %v1916_v46 = vld [vmem:[#allocation8_spill] sm:$0xff]  ;;  %v1917_v29 = vld [vmem:[#allocation5_spill] sm:$0xff] }
 0x2eb   :  { %v530_v30 = vmul.f32 %v991_v24, %v529_v15  ;;  %v633_v22 = vmul.f32 %v1248_v40, %v421_v57  ;;  %v787_v36 = vsel %vm129_vm0, %v776_v32, 0  ;;  %v571_v2 = vmul.f32 1.1111112, %v570_v35 }
 0x2ec   :  { %v770_v50 = vunpack.c.l.b16 %v693_v13  ;;  %v642_v23 = vmul.f32 %v1220_v28, %v556_v63  ;;  %793 = vmatpush.bf16.xpose.msra.mxu3 %v787_v36  ;;  %v713_v43 = vpack.c.b16 %v707_v25, %v706_v8  ;;  %v680_v40 = vpack.c.bf16 %v664_v9, %v664_v9  ;;  %v1915_v25 = vld [vmem:[#allocation7_spill] sm:$0xff] }
 0x2ed   :  { %v531_v20 = vadd.f32 %v991_v24, %v530_v30  ;;  %v665_v34 = vmul.f32 %v649_v3, %v633_v22  ;;  %v539_v6 = vor.u32 1.1754944e-38, %v538_v37  ;;  %v769_v42 = vunpack.c.l.b16 %v692_v55  ;;  %v656_v37 = vld [vmem:[%s1841_s1 + $0x40] sm:$0xff] }
 0x2ee   :  { %v643_v45 = vmul.f32 %v1241_v47, %v571_v2  ;;  %v674_v1 = vmul.f32 %v658_v27, %v642_v23  ;;  %vm537_vm6 = vcmp.eq.f32.partialorder %v536_v12, 8.507059e+37  ;;  %v640_v18 = vmul.f32 %v1239_v44, %v1732_v58  ;;  %v657_v12 = vld [vmem:[%s1841_s1 + $0x48] sm:$0xff]  ;;  %s1018_s1 = smov [#allocation2]  }
 0x2ef   :  { %v535_v59 = vsel %vm534_vm12, %v991_v24, %v531_v20  ;;  %v681_v28 = vpack.c.bf16 %v665_v34, %v665_v34  ;;  %v775_v4 = vpack.c.b16 %v770_v50, %v769_v42  ;;  %v720_v52 = vsel %vm129_vm0, %v713_v43, 0  ;;  %s838_s15 = sshll.u32 %s1018_s1, 4  ;;  %s839_s15 = int_to_ptr.vmem [resolvable:$true] %s838_s15 }
 0x2f0   :  { %v540_v21 = vsel %vm537_vm6, %v539_v6, %v535_v59  ;;  %v675_v17 = vmul.f32 %v659_v53, %v643_v45  ;;  %v704_v56 = vunpack.c.l.b16 %v680_v40  ;;  %734 = vmatpush.bf16.xpose.msra.mxu2 %v720_v52  ;;  %v690_v47 = vpack.c.bf16 %v674_v1, %v674_v1 }
 0x2f1   :  { %v541_v14 = vmul.f32 1.1111112, %v540_v21  ;;  %v705_v51 = vunpack.c.l.b16 %v681_v28  ;;  %v784_v44 = vsel %vm129_vm0, %v775_v4, 0  ;;  %v672_v49 = vmul.f32 %v656_v37, %v640_v18 }
 0x2f2   :  { %v691_v0 = vpack.c.bf16 %v675_v17, %v675_v17  ;;  %v767_v7 = vunpack.c.l.b16 %v690_v47 }
 0x2f3   :  { %v712_v10 = vpack.c.b16 %v705_v51, %v704_v56  ;;  %v641_v48 = vmul.f32 %v1252_v54, %v541_v14  ;;  %v688_v62 = vpack.c.bf16 %v672_v49, %v672_v49 }
 0x2f4   :  { %v768_v58 = vunpack.c.l.b16 %v691_v0  ;;  %794 = vmatpush.bf16.xpose.msra.mxu3 %v784_v44 }
 0x2f5   :  { %v673_v24 = vmul.f32 %v657_v12, %v641_v48  ;;  %v717_v60 = vsel %vm129_vm0, %v712_v10, 0  ;;  %v765_v41 = vunpack.c.l.b16 %v688_v62 }
 0x2f6   :  { %v774_v11 = vpack.c.b16 %v768_v58, %v767_v7 }
 0x2f7   :  { %v689_v16 = vpack.c.bf16 %v673_v24, %v673_v24 }
 0x2f8   :  { %735 = vmatpush.bf16.xpose.msra.mxu2 %v717_v60  ;;  %v781_v8 = vsel %vm129_vm0, %v774_v11, 0 }
 0x2f9   :  { %v766_v19 = vunpack.c.l.b16 %v689_v16 }
 0x2fb   :  { %v773_v61 = vpack.c.b16 %v766_v19, %v765_v41 }
 0x2fc   :  { %795 = vmatpush.bf16.xpose.msra.mxu3 %v781_v8 }
 0x2fd   :  { %v778_v54 = vsel %vm129_vm0, %v773_v61, 0 }
 0x2ff   :  { %860 = vmatmul.msk.bf16.vlgmr.msra.gmra.mxu2 %vm129_vm0, %v1084_v38  ;;  %v1918_v38 = vld [vmem:[#allocation6_spill] sm:$0xff] }
 0x304   :  { %796 = vmatpush.bf16.xpose.msra.mxu3 %v778_v54 }
 0x30b   :  { %864 = vmatmul.msk.bf16.vlgmr.msra.gmra.mxu3 %vm129_vm0, %v1086_v39 }
 0x30f   :  { %861 = vmatmul.msk.bf16.gmra.mxu2 %vm129_vm0, %v1104_v26 }
 0x31b   :  { %865 = vmatmul.msk.bf16.gmra.mxu3 %vm129_vm0, %v1914_v31 }
 0x31f   :  { %862 = vmatmul.msk.bf16.gmra.mxu2 %vm129_vm0, %v1915_v25 }
 0x32b   :  { %866 = vmatmul.msk.bf16.gmra.mxu3 %vm129_vm0, %v1916_v46 }
 0x32f   :  { %863 = vmatmul.msk.bf16.gmra.mxu2 %vm129_vm0, %v1917_v29 }
 0x33b   :  { %867 = vmatmul.msk.bf16.gmra.mxu3 %vm129_vm0, %v1918_v38 }
 0x382   :  { %v737_v5 = vpop.f32.mrf.mxu2 }
 0x383   :  { %818 = vst.msk [vmem:[#allocation2] sm:$0xff] %vm129_vm0, %v737_v5 }
 0x38a   :  { %v739_v39 = vpop.f32.mrf.mxu2 }
 0x38b   :  { %819 = vst.msk [vmem:[#allocation2 + $0x8] sm:$0xff] %vm129_vm0, %v739_v39 }
 0x38e   :  { %v798_v26 = vpop.f32.mrf.mxu3 }
 0x38f   :  { %826 = vst.msk [vmem:[#allocation2 + $0x40] sm:$0xff] %vm129_vm0, %v798_v26 }
 0x392   :  { %v742_v15 = vpop.f32.mrf.mxu2 }
 0x393   :  { %820 = vst.msk [vmem:[#allocation2 + $0x10] sm:$0xff] %vm129_vm0, %v742_v15 }
 0x396   :  { %v800_v57 = vpop.f32.mrf.mxu3 }
 0x397   :  { %827 = vst.msk [vmem:[#allocation2 + $0x48] sm:$0xff] %vm129_vm0, %v800_v57 }
 0x39a   :  { %v744_v33 = vpop.f32.mrf.mxu2 }
 0x39b   :  { %821 = vst.msk [vmem:[#allocation2 + $0x18] sm:$0xff] %vm129_vm0, %v744_v33 }
 0x39e   :  { %v803_v32 = vpop.f32.mrf.mxu3 }
 0x39f   :  { %828 = vst.msk [vmem:[#allocation2 + $0x50] sm:$0xff] %vm129_vm0, %v803_v32 }
 0x3a2   :  { %v747_v55 = vpop.f32.mrf.mxu2 }
 0x3a3   :  { %822 = vst.msk [vmem:[#allocation2 + $0x20] sm:$0xff] %vm129_vm0, %v747_v55 }
 0x3a6   :  { %v805_v13 = vpop.f32.mrf.mxu3 }
 0x3a7   :  { %829 = vst.msk [vmem:[#allocation2 + $0x58] sm:$0xff] %vm129_vm0, %v805_v13 }
 0x3aa   :  { %v749_v3 = vpop.f32.mrf.mxu2 }
 0x3ab   :  { %823 = vst.msk [vmem:[#allocation2 + $0x28] sm:$0xff] %vm129_vm0, %v749_v3 }
 0x3ae   :  { %v808_v63 = vpop.f32.mrf.mxu3 }
 0x3af   :  { %830 = vst.msk [vmem:[#allocation2 + $0x60] sm:$0xff] %vm129_vm0, %v808_v63 }
 0x3b2   :  { %v752_v30 = vpop.f32.mrf.mxu2 }
 0x3b3   :  { %824 = vst.msk [vmem:[#allocation2 + $0x30] sm:$0xff] %vm129_vm0, %v752_v30 }
 0x3b6   :  { %v810_v22 = vpop.f32.mrf.mxu3 }
 0x3b7   :  { %831 = vst.msk [vmem:[#allocation2 + $0x68] sm:$0xff] %vm129_vm0, %v810_v22 }
 0x3ba   :  { %v754_v9 = vpop.f32.mrf.mxu2 }
 0x3bb   :  { %825 = vst.msk [vmem:[#allocation2 + $0x38] sm:$0xff] %vm129_vm0, %v754_v9 }
 0x3be   :  { %v813_v35 = vpop.f32.mrf.mxu3 }
 0x3bf   :  { %832 = vst.msk [vmem:[#allocation2 + $0x70] sm:$0xff] %vm129_vm0, %v813_v35 }
 0x3c6   :  { %v815_v27 = vpop.f32.mrf.mxu3 }
 0x3c7   :  { %833 = vst.msk [vmem:[#allocation2 + $0x78] sm:$0xff] %vm129_vm0, %v815_v27 }
 0x3c8   :  { %846 = dma.vmem_to_hbm [thread:$0]  %s839_s15, 2048, %s841_s18, [#allocation3], %s1019_s19, %s1019_s19, %s1020_s20  }
 0x3c9   :  { %1016 = dma.done.wait [#allocation3], 2048  }
 0x3ca   :  { %1017 = vsyncadd [#allocation3], 4294965248 }
 0x3cb   :  { %851 = vsyncpa [#allocation3], 1 }

</bundles_post_ra>
